<compile_context>
chip_gen: v7x
topology: tpu7x:2x2x1
jax: 0.10.0
libtpu: 0.0.40
codegen_flags: <defaults>
</compile_context>

<pallas_src>
import functools
import math

import jax
import jax.numpy as jnp
from jax.experimental import pallas as pl
from jax.experimental.pallas import tpu as pltpu


_VMEM_LIMIT_BYTES = 32 * 1024 * 1024      # safe on v5e (128 MiB), v6e (128), v7x (64)
_TARGET_TILE_BYTES = 4 * 1024 * 1024      # per input buffer (x2 for double-buffering)


def _cdiv(a, b):
    return -(-a // b)


def _round_up(a, b):
    return _cdiv(a, b) * b


def _choose_row_tile(rows, cols, itemsize, align):
    """Largest row tile such that tile bytes ~= _TARGET_TILE_BYTES (capped by rows)."""
    cand = _TARGET_TILE_BYTES // max(1, cols * itemsize)
    cand = min(cand, _round_up(rows, align))
    cand = (cand // align) * align
    return int(max(align, cand))


def _partial_sum_kernel(x_ref, out_ref, acc_ref, *, tr, rows_total, needs_mask):
    """reduction='mean'/'sum' path.

    Grid (P, NT). Each step sums a (tr, C) tile into a vreg-shaped (8, C) f32
    accumulator; the cross-lane/cross-sublane collapse to a scalar happens once
    per parallel index p, producing one f32 partial per super-block.
    """
    p = pl.program_id(0)
    t = pl.program_id(1)

    @pl.when(t == 0)
    def _():
        acc_ref[...] = jnp.zeros_like(acc_ref)

    x = x_ref[...].astype(jnp.float32)                        # (tr, C)
    if needs_mask:
        # logical tile id = p * NT + t ; rows past rows_total contribute zero
        row0 = (p * pl.num_programs(1) + t) * tr
        rid = jax.lax.broadcasted_iota(jnp.int32, (tr, 1), 0) + row0
        x = jnp.where(rid < rows_total, x, 0.0)

    c = x.shape[-1]
    # (tr, C) -> (tr//8, 8, C) is a vreg-aligned regrouping; summing axis 0 is
    # pure VPU adds (no per-step XLU reduce).
    acc_ref[...] += jnp.sum(x.reshape(tr // 8, 8, c), axis=0)

    @pl.when(t == pl.num_programs(1) - 1)
    def _():
        out_ref[...] = jnp.sum(acc_ref[...]).reshape(1, 1, 1)


def _channel_sum_kernel(x_ref, out_ref, *, tr):
    """reduction='none' path: per-row channel sums, stored lane-dense (1,1,tr)."""
    x = x_ref[...].astype(jnp.float32)                        # (tr, C)
    row_sums = jnp.sum(x, axis=-1)                            # (tr,)  sublane-major
    # sublane->lane relayout rides the XLU; enables unmasked lane-dense stores.
    out_ref[...] = row_sums.reshape(1, 1, tr).astype(out_ref.dtype)


def base_loss_forward(loss, reduction="mean", channel_dim=-1, row_tile=None):
    """JAX/Pallas equivalent of BaseLoss.forward applied to a precomputed
    per-element loss tensor.

    Returns a scalar for reduction in {'mean','sum'}, and the channel-summed
    tensor (loss.shape minus channel_dim) for reduction='none'.
    """
    if reduction not in ("mean", "sum", "none"):
        raise ValueError("Invalid reduction method ({})".format(reduction))

    if channel_dim is None:
        if reduction == "none":
            return loss                      # no channel sum, no reduction
        x = loss.reshape(1, -1) if loss.ndim < 2 else loss.reshape(-1, loss.shape[-1])
        lead_shape = None
        mean_count = loss.size
    else:
        # TODO(synk): a non-last channel_dim makes moveaxis materialize a full
        #             transpose in HBM before the kernel (correct, but costly).
        x = jnp.moveaxis(loss, channel_dim, -1)
        lead_shape = x.shape[:-1]
        x = x.reshape(-1, x.shape[-1])
        mean_count = x.shape[0]

    rows, cols = x.shape
    itemsize = x.dtype.itemsize

    if reduction == "none":
        align = 128                                  # lane-dense output stores
        tr = row_tile if row_tile is not None else _choose_row_tile(
            rows, cols, itemsize, align)
        tr = max(align, _round_up(int(tr), align))
        nt = _cdiv(rows, tr)

        out = pl.pallas_call(
            functools.partial(_channel_sum_kernel, tr=tr),
            out_shape=jax.ShapeDtypeStruct((nt, 1, tr), loss.dtype),
            grid_spec=pltpu.PrefetchScalarGridSpec(
                num_scalar_prefetch=0,
                grid=(nt,),
                in_specs=[pl.BlockSpec((tr, cols), lambda i: (i, 0))],
                out_specs=pl.BlockSpec((1, 1, tr), lambda i: (i, 0, 0)),
            ),
            compiler_params=pltpu.CompilerParams(
                dimension_semantics=("parallel",),
                vmem_limit_bytes=_VMEM_LIMIT_BYTES),
        )(x)
        # rows beyond `rows` (ragged last tile) hold garbage sums; slice them off.
        return out.reshape(-1)[:rows].reshape(lead_shape)

    # ---- reduction in {'mean', 'sum'} ------------------------------------
    align = 8
    tr = row_tile if row_tile is not None else _choose_row_tile(
        rows, cols, itemsize, align)
    tr = max(align, _round_up(int(tr), align))
    nt_total = _cdiv(rows, tr)

    # Split the tile axis into (parallel, arbitrary) so v7x's two TensorCores
    # each own a contiguous half of the rows; single-TC chips just loop over p.
    p_dim = 2 if nt_total >= 2 else 1
    nt_inner = _cdiv(nt_total, p_dim)
    needs_mask = (p_dim * nt_inner * tr != rows)

    def _in_index_map(p, t):
        # Clamp phantom trailing tiles of the last super-block onto the final
        # real tile; their rows are zero-masked inside the kernel.
        return (jnp.minimum(p * nt_inner + t, nt_total - 1), 0)

    partials = pl.pallas_call(
        functools.partial(_partial_sum_kernel, tr=tr, rows_total=rows,
                          needs_mask=needs_mask),
        out_shape=jax.ShapeDtypeStruct((p_dim, 1, 1), jnp.float32),
        grid_spec=pltpu.PrefetchScalarGridSpec(
            num_scalar_prefetch=0,
            grid=(p_dim, nt_inner),
            in_specs=[pl.BlockSpec((tr, cols), _in_index_map)],
            out_specs=pl.BlockSpec((1, 1, 1), lambda p, t: (p, 0, 0)),
            scratch_shapes=[pltpu.VMEM((8, cols), jnp.float32)],
        ),
        compiler_params=pltpu.CompilerParams(
            dimension_semantics=("parallel", "arbitrary"),
            vmem_limit_bytes=_VMEM_LIMIT_BYTES),
    )(x)

    total = jnp.sum(partials)
    if reduction == "mean":
        total = total / jnp.float32(mean_count)
    return total.astype(loss.dtype)


if __name__ == "__main__":
    key = jax.random.PRNGKey(0)
    k1, k2 = jax.random.split(key)

    # pure-JAX reference for BaseLoss.forward on a precomputed loss tensor
    def ref(l, reduction, channel_dim=-1):
        r = jnp.sum(l, axis=channel_dim) if channel_dim is not None else l
        if reduction == "mean":
            return jnp.mean(r)
        if reduction == "sum":
            return jnp.sum(r)
        return r

    # case 1: per-element loss [batch=2, seq=8, hidden(channel)=32], default tiling
    loss1 = jax.random.normal(k1, (2, 8, 32), dtype=jnp.float32)
    out = jax.block_until_ready(base_loss_forward(loss1, "mean"))
    assert jnp.allclose(out, ref(loss1, "mean"), atol=1e-5, rtol=1e-5)
    out = jax.block_until_ready(base_loss_forward(loss1, "sum"))
    assert jnp.allclose(out, ref(loss1, "sum"), atol=1e-4, rtol=1e-5)
    out = jax.block_until_ready(base_loss_forward(loss1, "none"))
    assert jnp.allclose(out, ref(loss1, "none"), atol=1e-4, rtol=1e-5)

    # case 2: multi-tile + ragged rows + 2-way parallel split (forced row_tile=128)
    loss2 = jax.random.normal(k2, (4, 100, 32), dtype=jnp.float32)
    out = jax.block_until_ready(base_loss_forward(loss2, "mean", row_tile=128))
    assert jnp.allclose(out, ref(loss2, "mean"), atol=1e-4, rtol=1e-5)
    out = jax.block_until_ready(base_loss_forward(loss2, "sum", row_tile=128))
    assert jnp.allclose(out, ref(loss2, "sum"), atol=1e-3, rtol=1e-5)
    out = jax.block_until_ready(base_loss_forward(loss2, "none", row_tile=128))
    assert jnp.allclose(out, ref(loss2, "none"), atol=1e-4, rtol=1e-5)

    # case 3: non-default channel_dim (wrapper glue path)
    loss3 = jnp.transpose(loss1, (0, 2, 1))              # channel at dim 1
    out = jax.block_until_ready(base_loss_forward(loss3, "none", channel_dim=1))
    assert jnp.allclose(out, ref(loss3, "none", channel_dim=1), atol=1e-4, rtol=1e-5)

    print("KERNEL_OK")
</pallas_src>

<mosaic_0001>
module attributes {stable_mosaic.version = 11 : i64} {
  func.func @_partial_sum_kernel(%arg0: i32, %arg1: i32, %arg2: memref<16x32xf32, #tpu.memory_space<vmem>>, %arg3: memref<1x1x1xf32, #tpu.memory_space<vmem>>, %arg4: memref<8x32xf32, #tpu.memory_space<vmem>>) attributes {dimension_semantics = [#tpu.dimension_semantics<parallel>, #tpu.dimension_semantics<arbitrary>], iteration_bounds = array<i64: 1, 1>, scalar_prefetch = 0 : i64, scratch_operands = 1 : i64, tpu.core_type = #tpu.core_type<tc>, window_params = [{transform_indices = @transform_0, window_bounds = array<i64: 16, 32>}, {transform_indices = @transform_1, window_bounds = array<i64: 1, 1, 1>}]} {
    %c0_i32 = arith.constant 0 : i32
    %0 = arith.cmpi eq, %arg1, %c0_i32 : i32
    %1 = arith.extui %0 : i1 to i32
    %c0_i32_0 = arith.constant 0 : i32
    %2 = arith.cmpi ne, %1, %c0_i32_0 : i32
    scf.if %2 {
      %cst_8 = arith.constant 0.000000e+00 : f32
      %12 = vector.broadcast %cst_8 : f32 to vector<8x32xf32>
      %c0_9 = arith.constant 0 : index
      %c0_10 = arith.constant 0 : index
      %13 = vector.load %arg4[%c0_9, %c0_10] : memref<8x32xf32, #tpu.memory_space<vmem>>, vector<8x32xf32>
      tpu.vector_store %arg4[%c0_9, %c0_10], %12 {strides = array<i32>} : memref<8x32xf32, #tpu.memory_space<vmem>>, vector<8x32xf32>,
    } else {
    }
    %c0 = arith.constant 0 : index
    %c0_1 = arith.constant 0 : index
    %3 = vector.load %arg2[%c0, %c0_1] : memref<16x32xf32, #tpu.memory_space<vmem>>, vector<16x32xf32>
    %c0_2 = arith.constant 0 : index
    %c0_3 = arith.constant 0 : index
    %4 = vector.load %arg4[%c0_2, %c0_3] : memref<8x32xf32, #tpu.memory_space<vmem>>, vector<8x32xf32>
    %5 = vector.shape_cast %3 : vector<16x32xf32> to vector<2x8x32xf32>
    %cst = arith.constant dense<0.000000e+00> : vector<8x32xf32>
    %6 = vector.multi_reduction <add>, %5, %cst [0] : vector<2x8x32xf32> to vector<8x32xf32>
    %7 = arith.addf %4, %6 : vector<8x32xf32>
    %c0_4 = arith.constant 0 : index
    %c0_5 = arith.constant 0 : index
    %8 = vector.load %arg4[%c0_4, %c0_5] : memref<8x32xf32, #tpu.memory_space<vmem>>, vector<8x32xf32>
    tpu.vector_store %arg4[%c0_4, %c0_5], %7 {strides = array<i32>} : memref<8x32xf32, #tpu.memory_space<vmem>>, vector<8x32xf32>,
    %c0_i32_6 = arith.constant 0 : i32
    %9 = arith.cmpi eq, %arg1, %c0_i32_6 : i32
    %10 = arith.extui %9 : i1 to i32
    %c0_i32_7 = arith.constant 0 : i32
    %11 = arith.cmpi ne, %10, %c0_i32_7 : i32
    scf.if %11 {
      %c0_8 = arith.constant 0 : index
      %c0_9 = arith.constant 0 : index
      %12 = vector.load %arg4[%c0_8, %c0_9] : memref<8x32xf32, #tpu.memory_space<vmem>>, vector<8x32xf32>
      %13 = vector.shape_cast %12 : vector<8x32xf32> to vector<1x8x32xf32>
      %cst_10 = arith.constant dense<0.000000e+00> : vector<1xf32>
      %14 = vector.multi_reduction <add>, %13, %cst_10 [1, 2] : vector<1x8x32xf32> to vector<1xf32>
      %15 = vector.shape_cast %14 : vector<1xf32> to vector<1x1x1xf32>
      %16 = vector.extract %15[0, 0, 0] : f32 from vector<1x1x1xf32>
      %17 = vector.broadcast %16 : f32 to vector<1x1x1xf32>
      %c0_11 = arith.constant 0 : index
      %c0_12 = arith.constant 0 : index
      %c0_13 = arith.constant 0 : index
      %18 = vector.load %arg3[%c0_11, %c0_12, %c0_13] : memref<1x1x1xf32, #tpu.memory_space<vmem>>, vector<1x1x1xf32>
      tpu.vector_store %arg3[%c0_11, %c0_12, %c0_13], %17 {strides = array<i32>} : memref<1x1x1xf32, #tpu.memory_space<vmem>>, vector<1x1x1xf32>,
    } else {
    }
    return
  }
  func.func @transform_0(%arg0: i32, %arg1: i32) -> (i32, i32) {
    %c1_i32 = arith.constant 1 : i32
    %0 = arith.muli %arg0, %c1_i32 : i32
    %1 = arith.addi %0, %arg1 : i32
    %c0_i32 = arith.constant 0 : i32
    %2 = arith.minsi %1, %c0_i32 : i32
    %c0_i32_0 = arith.constant 0 : i32
    %c0_i32_1 = arith.constant 0 : i32
    return %2, %c0_i32_0 : i32, i32
  }
  func.func @transform_1(%arg0: i32, %arg1: i32) -> (i32, i32, i32) {
    %c0_i32 = arith.constant 0 : i32
    %c0_i32_0 = arith.constant 0 : i32
    %c0_i32_1 = arith.constant 0 : i32
    return %arg0, %c0_i32, %c0_i32_0 : i32, i32, i32
  }
}

</mosaic_0001>

<bundles_post_ra>
// kernel: tpu_custom_call.1
= control target key start
LH: loop header
LB: loop body
LE: loop exit
PB: predicated region body
PF: predicated region fallthrough
CT: control target
= control target key end

     0   :  { %6 = vsyncpa [#allocation4], 0  ;;  %s176_s0 = inlined_call_operand.hbm [shape: f32[16,32], index: 0, kind: input, shape index: {}]   ;;  %s177_s1 = inlined_call_operand.hbm [shape: f32[1,1,1], index: 1, kind: output, shape index: {}]  }
   0x1   :  { %7 = vsyncpa [#allocation5], 0  ;;  %s137_s6 = smov [#allocation3]   ;;  %s89_s10 = scalar_lea.hbm %s176_s0, 256 }
   0x2   :  { %s19_s7 = sshll.u32 %s137_s6, 4  ;;  %p90_p0 = scmp.ne.s32.totalorder %s176_s0, %s89_s10  ;;  %s20_s7 = int_to_ptr.vmem [resolvable:$true] %s19_s7 }
   0x3   :  { %p93_p1 = scmp.lt.u32.totalorder %s89_s10, %s176_s0 }
   0x5   :  { %p95_p2 = pnand %p93_p1, %p90_p0 }
   0x7   :  { %98 = shalt.err (!%p95_p2)
}
   0x8   :  { %s99_s15 = scalar_lea.vmem %s20_s7, 256  ;;  %p104_p4 = scmp.lt.s32.totalorder %s20_s7, %s20_s7 }
   0x9   :  { %p100_p3 = scmp.ne.s32.totalorder %s20_s7, %s99_s15  ;;  %p105_p5 = scmp.lt.s32.totalorder %s99_s15, %s99_s15 }
   0xb   :  { %p106_p6 = por %p105_p5, %p104_p4 }
   0xd   :  { %p107_p7 = pnand %p106_p6, %p100_p3 }
   0xf   :  { %110 = shalt.err (!%p107_p7)
}
  0x10   :  { %s138_s16 = smov 128   ;;  %s139_s17 = smov 8  }
  0x11   :  { %25 = dma.hbm_to_vmem [thread:$0]  %s176_s0, 256, %s20_s7, [#allocation4], %s138_s16, %s138_s16, %s139_s17  }
  0x12   :  { %133 = dma.done.wait [#allocation4], 256  }
  0x13   :  { %134 = vsyncadd [#allocation4], 4294967040  ;;  %vm37_vm0 = vcmask 261120   ;;  %v140_v0 = vmov 0.0   ;;  %v39_v1 = vld [vmem:[#allocation3] sm:$0xff]  ;;  %v40_v2 = vld [vmem:[#allocation3 + $0x8] sm:$0xff] }
  0x14   :  { %38 = vst.msk [vmem:[#allocation2] sm:$0xff] %vm37_vm0, %v140_v0  ;;  %v43_v4 = vsel %vm37_vm0, %v39_v1, 0.0  ;;  %v44_v5 = vsel %vm37_vm0, %v40_v2, 0.0  ;;  %s141_s0 = smov [#allocation6]   ;;  %vm63_vm1 = vcmask 0  }
  0x15   :  { %v45_v6 = vadd.f32 %v44_v5, %v43_v4  ;;  %s71_s20 = sshll.u32 %s141_s0, 4  ;;  %s72_s20 = int_to_ptr.vmem [resolvable:$true] %s71_s20 }
  0x16   :  { %s111_s22 = scalar_lea.vmem %s72_s20, 16  ;;  %s115_s23 = scalar_lea.vmem %s72_s20, 32 }
  0x17   :  { %p112_p8 = scmp.ne.s32.totalorder %s72_s20, %s111_s22  ;;  %p116_p9 = scmp.lt.s32.totalorder %s72_s20, %s72_s20 }
  0x18   :  { %p117_p10 = scmp.lt.s32.totalorder %s115_s23, %s111_s22 }
  0x1a   :  { %p118_p11 = por %p117_p10, %p116_p9 }
  0x1b   :  { %v41_v3 = vld [vmem:[#allocation2] sm:$0xff] }
  0x1c   :  { %v46_v7 = vadd.f32 %v45_v6, %v41_v3  ;;  %p119_p12 = pnand %p118_p11, %p112_p8 }
  0x1e   :  { %47 = vst.msk [vmem:[#allocation2] sm:$0xff] %vm37_vm0, %v46_v7 }
  0x25   :  { %v51_v8 = vld [vmem:[#allocation2] sm:$0xff] }
  0x26   :  { %v52_v9 = vsel %vm37_vm0, %v51_v8, 0.0 }
  0x27   :  { %53 = vadd.xlane.f32.xlu0 %v52_v9 }
  0xb4   :  { %v54_v10 = vpop.xlane.xlu0 %53 }
  0xb5   :  { %v55_v11 = vrot.slane %v54_v10, 4 }
  0xb7   :  { %v56_v12 = vadd.f32 %v55_v11, %v54_v10 }
  0xb9   :  { %v57_v13 = vrot.slane %v56_v12, 2 }
  0xbb   :  { %v58_v14 = vadd.f32 %v57_v13, %v56_v12 }
  0xbd   :  { %v59_v15 = vrot.slane %v58_v14, 1 }
  0xbf   :  { %v60_v16 = vadd.f32 %v59_v15, %v58_v14 }
  0xc1   :  { %82 = vpush %v60_v16 }
  0xf2   :  { %s83_s21 = spop %82 }
  0xf3   :  { %v62_v17 = vstv %s83_s21 }
  0xf4   :  { %64 = vst.msk [vmem:[#allocation6] sm:$0x1] %vm63_vm1, %v62_v17 }
  0xf5   :  { %122 = shalt.err (!%p119_p12)
}
  0xf6   :  { %s123_s26 = scalar_lea.hbm %s177_s1, 16 }
  0xf7   :  { %p124_p13 = scmp.ne.s32.totalorder %s177_s1, %s123_s26  ;;  %p127_p0 = scmp.lt.u32.totalorder %s123_s26, %s177_s1 }
  0xf9   :  { %p129_p1 = pnand %p127_p0, %p124_p13 }
  0xfb   :  { %132 = shalt.err (!%p129_p1)
}
  0xfc   :  { %74 = dma.vmem_to_hbm [thread:$0]  %s72_s20, 16, %s177_s1, [#allocation5]  }
  0xfd   :  { %135 = dma.done.wait [#allocation5], 16  }
  0xfe   :  { %136 = vsyncadd [#allocation5], 4294967280 }
  0xff   :  { %78 = vsyncpa [#allocation4], 1 }
 0x100   :  { %79 = vsyncpa [#allocation5], 1 }

</bundles_post_ra>
